<compile_context>
chip_gen: v6e
topology: v6e:2x2x1
jax: 0.10.0
libtpu: 0.0.40
codegen_flags: <defaults>
</compile_context>

<pallas_src>
import functools

import jax
import jax.numpy as jnp
from jax import lax
from jax.experimental import pallas as pl
from jax.experimental.pallas import tpu as pltpu

LANE = 128
TM_TARGET = 512            # target rows feeding the folded shared-W matmul
STEP_ADJ_TARGET = 8 << 20  # target adj bytes per grid step (amortize overhead)


def _round_up(x, m):
    return ((x + m - 1) // m) * m


def _cdiv(a, b):
    return (a + b - 1) // b


def _vmem_capacity_bytes():
    try:
        cap = getattr(pltpu.get_tpu_info(), "vmem_capacity_bytes", None)
        if cap:
            return max(int(cap), 32 << 20)
    except Exception:
        pass
    return 64 << 20  # conservative fallback (v7x per-core VMEM)


def _make_gcn_kernel(*, add_self, slab_self, normalize_embedding, relu_mode,
                     has_bias, compute_dtype, n_nodes, tm, tk, multi_k):
    """Ref order: adj, x, [xr], w, [bias], out, [acc]."""
    xr_operand = add_self and not slab_self

    def kernel(*refs):
        i = 0
        adj_ref = refs[i]; i += 1              # (bt, tm, tk)  stored dtype
        x_ref = refs[i]; i += 1                # (bt, tk, Din) stored dtype
        xr_ref = None
        if xr_operand:
            xr_ref = refs[i]; i += 1           # (bt, tm, Din) stored dtype
        w_ref = refs[i]; i += 1                # (Din, Dout)   compute dtype (resident)
        b_ref = None
        if has_bias:
            b_ref = refs[i]; i += 1            # (1, Dout)     f32 (resident)
        o_ref = refs[i]; i += 1                # (bt, tm, Dout)
        acc_ref = refs[i] if multi_k else None  # (bt, tm, Din) f32 scratch

        def aggregate():
            # In-kernel cast: VPU work hidden under the HBM-bound adj DMA.
            adj_t = adj_ref[...].astype(compute_dtype)
            x_t = x_ref[...].astype(compute_dtype)
            if multi_k:
                # The last K tile may read past N (stale VMEM).  Zero BOTH
                # operands' out-of-range K entries so garbage (possibly NaN)
                # cannot contaminate valid rows through 0 * NaN.
                k0 = pl.program_id(2) * tk
                col = k0 + lax.broadcasted_iota(jnp.int32, adj_t.shape, 2)
                adj_t = jnp.where(col < n_nodes, adj_t, jnp.zeros_like(adj_t))
                row = k0 + lax.broadcasted_iota(jnp.int32, x_t.shape, 1)
                x_t = jnp.where(row < n_nodes, x_t, jnp.zeros_like(x_t))
            return jnp.einsum("bmn,bnd->bmd", adj_t, x_t,
                              preferred_element_type=jnp.float32)

        def epilogue(h):
            if add_self:
                if slab_self:
                    # K untiled and tm | N: row tile is already resident in x.
                    xr = x_ref[:, pl.ds(pl.program_id(1) * tm, tm), :]
                else:
                    xr = xr_ref[...]
                h = h + xr.astype(jnp.float32)
            bt_, tm_, din = h.shape
            dout = o_ref.shape[-1]
            # Fold (batch-tile, row-tile) -> one large M for the shared-W matmul.
            h2 = h.reshape(bt_ * tm_, din).astype(compute_dtype)
            y = jnp.dot(h2, w_ref[...], preferred_element_type=jnp.float32)
            if has_bias:
                y = y + b_ref[...]
            if normalize_embedding:
                # F.normalize(p=2, dim=2): y / max(||y||, 1e-12); rsqrt -> EUP.
                ssq = jnp.sum(y * y, axis=-1, keepdims=True)
                y = y * lax.rsqrt(jnp.maximum(ssq, 1e-24))
            if relu_mode == "relu":
                y = jnp.maximum(y, 0.0)
            elif relu_mode == "lrelu":
                y = jnp.where(y > 0.0, y, 0.1 * y)  # module hard-codes slope 0.1
            o_ref[...] = y.reshape(bt_, tm_, dout).astype(o_ref.dtype)

        if multi_k:
            k = pl.program_id(2)

            @pl.when(k == 0)
            def _():
                acc_ref[...] = jnp.zeros_like(acc_ref)

            acc_ref[...] += aggregate()

            @pl.when(k == pl.num_programs(2) - 1)
            def _():
                epilogue(acc_ref[...])
        else:
            epilogue(aggregate())

    return kernel


@functools.partial(
    jax.jit,
    static_argnames=("add_self", "normalize_embedding", "relu_mode",
                     "compute_dtype", "out_dtype", "tile_rows", "tile_k"),
)
def gcn_block(x, adj, mask, weight, bias=None, *, add_self=False,
              normalize_embedding=False, relu_mode=0,
              compute_dtype=jnp.bfloat16, out_dtype=None,
              tile_rows=None, tile_k=None):
    """Pallas TPU implementation of GCNBlock.forward (bn=0, dropout=0 path)."""
    del mask  # mask is only consumed by the bn=1 path of the torch module.
    # TODO(synk): BatchNorm1d over mask-packed nodes (bn=1 path) and
    # training-mode dropout are not implemented (module defaults bn=0, p=0.0).
    # TODO(synk): optional int8 MXU path (v5e/v6e) when both adj and x are quantized.

    B, N, Din = x.shape
    Dout = weight.shape[1]
    has_bias = bias is not None
    out_dtype = x.dtype if out_dtype is None else out_dtype

    adj_item = jnp.dtype(adj.dtype).itemsize
    x_item = jnp.dtype(x.dtype).itemsize
    c_item = jnp.dtype(compute_dtype).itemsize
    o_item = jnp.dtype(out_dtype).itemsize

    # Sublane alignment for row tiles (packed dtypes need 16/32-row multiples).
    min_item = min(adj_item, x_item, o_item)
    row_align = {4: 8, 2: 16, 1: 32}.get(min_item, 8)

    # ---- generation-aware VMEM budget ------------------------------------
    cap = _vmem_capacity_bytes()
    budget = int(cap * 0.78)          # ~100 MiB on v5e/v6e, ~50 MiB on v7x
    vmem_limit = int(cap * 0.85)

    # ---- row tile (minimize padding; never over-pad to a fixed 512) ------
    if tile_rows is not None:
        tm = min(int(tile_rows), N)
        if tm < N:
            tm = _round_up(tm, row_align)
            if tm >= N:
                tm = N
    elif N <= TM_TARGET:
        tm = N
    else:
        tm = _round_up(_cdiv(N, _cdiv(N, TM_TARGET)), row_align)

    # ---- K tile (adj columns == x node rows) ------------------------------
    if tile_k is not None:
        tk = min(int(tile_k), N)
        if tk < N:
            tk = _round_up(tk, LANE)
            if tk >= N:
                tk = N
    else:
        tk = N  # resident x slab (read once per batch tile) if it fits

    # ---- graphs per step ---------------------------------------------------
    bt = max(1, min(B, TM_TARGET // max(tm, 1)))

    def vmem_bytes(bt_, tm_, tk_):
        adj_b = bt_ * tm_ * tk_ * adj_item
        x_b = bt_ * tk_ * Din * x_item
        xr_b = bt_ * tm_ * Din * x_item if add_self else 0
        out_b = bt_ * tm_ * Dout * o_item
        w_b = Din * Dout * c_item
        bias_b = Dout * 4 if has_bias else 0
        acc_b = bt_ * tm_ * Din * 4
        tmp_b = bt_ * tm_ * (Din * c_item + Dout * 4)  # epilogue intermediates
        return 2 * (adj_b + x_b + xr_b + out_b + w_b + bias_b) + acc_b + tmp_b

    # Shrink order: graphs/step, then tile K (keeps tm large), then rows.
    while vmem_bytes(bt, tm, tk) > budget and bt > 1:
        bt = max(1, bt // 2)
    if tile_k is None:
        while vmem_bytes(bt, tm, tk) > budget and tk > LANE:
            tk = max(LANE, _round_up(_cdiv(tk, 2), LANE))
    if tile_rows is None:
        while vmem_bytes(bt, tm, tk) > budget and tm > row_align:
            tm = max(row_align, _round_up(tm // 2, row_align))

    # Grow graphs/step until a grid step moves ~8 MiB of adj (amortizes the
    # fixed ~0.35 us/step overhead; matters most at v7x's 3.2 TB/s HBM).
    while (bt < B and bt * tm * tk * adj_item < STEP_ADJ_TARGET
           and vmem_bytes(min(B, 2 * bt), tm, tk) <= budget):
        bt = min(B, 2 * bt)

    k_tiles = _cdiv(N, tk)
    multi_k = k_tiles > 1
    slab_self = bool(add_self) and (not multi_k) and (N % tm == 0)
    xr_operand = bool(add_self) and not slab_self

    # ---- specs / operands (no padding, no wrapper-side casts of adj/x) ----
    in_specs = [
        pl.BlockSpec((bt, tm, tk), lambda bi, ri, k: (bi, ri, k)),    # adj tile
        pl.BlockSpec((bt, tk, Din), lambda bi, ri, k: (bi, k, 0)),    # x K-slab
    ]
    operands = [adj, x]
    if xr_operand:
        in_specs.append(pl.BlockSpec((bt, tm, Din), lambda bi, ri, k: (bi, ri, 0)))
        operands.append(x)
    in_specs.append(pl.BlockSpec((Din, Dout), lambda bi, ri, k: (0, 0)))  # W resident
    operands.append(weight.astype(compute_dtype))
    if has_bias:
        in_specs.append(pl.BlockSpec((1, Dout), lambda bi, ri, k: (0, 0)))
        operands.append(bias.astype(jnp.float32).reshape(1, Dout))

    scratch_shapes = [pltpu.VMEM((bt, tm, Din), jnp.float32)] if multi_k else []

    kernel = _make_gcn_kernel(
        add_self=bool(add_self), slab_self=slab_self,
        normalize_embedding=bool(normalize_embedding), relu_mode=relu_mode,
        has_bias=has_bias, compute_dtype=compute_dtype,
        n_nodes=N, tm=tm, tk=tk, multi_k=multi_k)

    return pl.pallas_call(
        kernel,
        out_shape=jax.ShapeDtypeStruct((B, N, Dout), out_dtype),
        grid_spec=pltpu.PrefetchScalarGridSpec(
            num_scalar_prefetch=0,
            grid=(_cdiv(B, bt), _cdiv(N, tm), k_tiles),
            in_specs=in_specs,
            out_specs=pl.BlockSpec((bt, tm, Dout), lambda bi, ri, k: (bi, ri, 0)),
            scratch_shapes=scratch_shapes,
        ),
        compiler_params=pltpu.CompilerParams(
            dimension_semantics=("parallel", "parallel", "arbitrary"),
            vmem_limit_bytes=vmem_limit,
        ),
    )(*operands)


def _xavier_normal(key, fan_in, fan_out, dtype=jnp.float32):
    # matches torch.nn.init.xavier_normal_ (gain=1)
    std = (2.0 / (fan_in + fan_out)) ** 0.5
    return std * jax.random.normal(key, (fan_in, fan_out), dtype=dtype)


def _reference(x, adj, weight, bias, *, add_self, normalize_embedding, relu_mode,
               compute_dtype):
    """Plain-JAX reference simulating the kernel's bf16 casts (f32 accumulate)."""
    f32 = jnp.float32
    adj_c = adj.astype(compute_dtype).astype(f32)
    x_c = x.astype(compute_dtype).astype(f32)
    w_c = weight.astype(compute_dtype).astype(f32)
    h = jnp.einsum("bij,bjd->bid", adj_c, x_c, precision=lax.Precision.HIGHEST)
    if add_self:
        h = h + x.astype(f32)               # kernel adds the un-rounded stored x
    h = h.astype(compute_dtype).astype(f32)  # h is rounded before the W matmul
    y = jnp.einsum("bnd,de->bne", h, w_c, precision=lax.Precision.HIGHEST)
    if bias is not None:
        y = y + bias.astype(f32)
    if normalize_embedding:
        nrm = jnp.sqrt(jnp.sum(y * y, axis=-1, keepdims=True))
        y = y / jnp.maximum(nrm, 1e-12)
    if relu_mode == "relu":
        y = jnp.maximum(y, 0.0)
    elif relu_mode == "lrelu":
        y = jnp.where(y > 0.0, y, 0.1 * y)
    return y


if __name__ == "__main__":
    key = jax.random.PRNGKey(0)
    keys = jax.random.split(key, 8)

    # --- Configs 1/2: module-default small shapes (B=2, N=16, 32->32). -----
    B, N, Din, Dout = 2, 16, 32, 32
    x = jax.random.normal(keys[0], (B, N, Din), dtype=jnp.float32)
    a = jax.random.uniform(keys[1], (B, N, N), dtype=jnp.float32)
    adj = 0.5 * (a + jnp.transpose(a, (0, 2, 1))) + jnp.eye(N, dtype=jnp.float32)[None]
    mask = jnp.ones((B, N), dtype=jnp.float32)
    weight = _xavier_normal(keys[2], Din, Dout)
    bias = 0.1 * jax.random.normal(keys[3], (Dout,), dtype=jnp.float32)

    # Config 1: torch defaults (add_self=0, normalize=0, relu=0, bias=True).
    y1 = gcn_block(x, adj, mask, weight, bias,
                   add_self=False, normalize_embedding=False, relu_mode=0)
    jax.block_until_ready(y1)
    r1 = _reference(x, adj, weight, bias, add_self=False, normalize_embedding=False,
                    relu_mode=0, compute_dtype=jnp.bfloat16)
    assert y1.shape == (B, N, Dout)
    assert jnp.allclose(y1, r1, atol=1e-2, rtol=1e-2), float(jnp.max(jnp.abs(y1 - r1)))

    # Config 2: fused add_self (resident-slab path) / L2-normalize / leaky-relu.
    y2 = gcn_block(x, adj, mask, weight, bias,
                   add_self=True, normalize_embedding=True, relu_mode="lrelu")
    jax.block_until_ready(y2)
    r2 = _reference(x, adj, weight, bias, add_self=True, normalize_embedding=True,
                    relu_mode="lrelu", compute_dtype=jnp.bfloat16)
    assert jnp.allclose(y2, r2, atol=1e-2, rtol=1e-2), float(jnp.max(jnp.abs(y2 - r2)))

    # Config 3: forced small tiles -> exercises the K-reduction accumulator,
    # partial edge row/K blocks (masked), xr-operand add_self and bf16 writeback.
    B3, N3, Din3, Dout3 = 2, 160, 32, 64
    x3 = jax.random.normal(keys[4], (B3, N3, Din3), dtype=jnp.float32)
    a3 = jax.random.uniform(keys[5], (B3, N3, N3), dtype=jnp.float32)
    adj3 = 0.5 * (a3 + jnp.transpose(a3, (0, 2, 1))) + jnp.eye(N3, dtype=jnp.float32)[None]
    mask3 = jnp.ones((B3, N3), dtype=jnp.float32)
    w3 = _xavier_normal(keys[6], Din3, Dout3)
    b3 = 0.1 * jax.random.normal(keys[7], (Dout3,), dtype=jnp.float32)

    y3 = gcn_block(x3, adj3, mask3, w3, b3,
                   add_self=True, normalize_embedding=True, relu_mode="lrelu",
                   out_dtype=jnp.bfloat16, tile_rows=64, tile_k=128)
    jax.block_until_ready(y3)
    r3 = _reference(x3, adj3, w3, b3, add_self=True, normalize_embedding=True,
                    relu_mode="lrelu", compute_dtype=jnp.bfloat16)
    assert y3.shape == (B3, N3, Dout3) and y3.dtype == jnp.bfloat16
    err3 = float(jnp.max(jnp.abs(y3.astype(jnp.float32) - r3)))
    assert jnp.allclose(y3.astype(jnp.float32), r3, atol=2e-2, rtol=2e-2), err3

    print("KERNEL_OK")
</pallas_src>

<mosaic_0001>
module attributes {stable_mosaic.version = 11 : i64} {
  func.func @kernel(%arg0: i32, %arg1: i32, %arg2: i32, %arg3: memref<2x16x16xf32, #tpu.memory_space<vmem>>, %arg4: memref<2x16x32xf32, #tpu.memory_space<vmem>>, %arg5: memref<32x32xbf16, #tpu.memory_space<vmem>>, %arg6: memref<1x32xf32, #tpu.memory_space<vmem>>, %arg7: memref<2x16x32xf32, #tpu.memory_space<vmem>>) attributes {dimension_semantics = [#tpu.dimension_semantics<parallel>, #tpu.dimension_semantics<parallel>, #tpu.dimension_semantics<arbitrary>], iteration_bounds = array<i64: 1, 1, 1>, scalar_prefetch = 0 : i64, scratch_operands = 0 : i64, tpu.core_type = #tpu.core_type<tc>, window_params = [{transform_indices = @transform_0, window_bounds = array<i64: 2, 16, 16>}, {transform_indices = @transform_1, window_bounds = array<i64: 2, 16, 32>}, {pipeline_mode = #tpu.pipeline_mode<synchronous>, transform_indices = @transform_2, window_bounds = array<i64: 32, 32>}, {pipeline_mode = #tpu.pipeline_mode<synchronous>, transform_indices = @transform_3, window_bounds = array<i64: 1, 32>}, {transform_indices = @transform_4, window_bounds = array<i64: 2, 16, 32>}]} {
    %c0 = arith.constant 0 : index
    %c0_0 = arith.constant 0 : index
    %c0_1 = arith.constant 0 : index
    %0 = vector.load %arg3[%c0, %c0_0, %c0_1] : memref<2x16x16xf32, #tpu.memory_space<vmem>>, vector<2x16x16xf32>
    %1 = arith.truncf %0 : vector<2x16x16xf32> to vector<2x16x16xbf16>
    %c0_2 = arith.constant 0 : index
    %c0_3 = arith.constant 0 : index
    %c0_4 = arith.constant 0 : index
    %2 = vector.load %arg4[%c0_2, %c0_3, %c0_4] : memref<2x16x32xf32, #tpu.memory_space<vmem>>, vector<2x16x32xf32>
    %3 = arith.truncf %2 : vector<2x16x32xf32> to vector<2x16x32xbf16>
    "tpu.trace_start"() <{level = 10 : i32, message = "bmn,bnd->bmd"}> : () -> ()
    %cst = arith.constant dense<0.000000e+00> : vector<2x16x32xf32>
    %4 = tpu.matmul %1, %3, %cst {dimension_numbers = #tpu.dot_dimension_numbers<[2], [1], [1], [2], [0, 0, 0, 1, 1, 2], [0], [0]>} : vector<2x16x16xbf16>, vector<2x16x32xbf16>, vector<2x16x32xf32> -> vector<2x16x32xf32>
    "tpu.trace_stop"() : () -> ()
    %5 = vector.shape_cast %4 : vector<2x16x32xf32> to vector<32x32xf32>
    %6 = arith.truncf %5 : vector<32x32xf32> to vector<32x32xbf16>
    %c0_5 = arith.constant 0 : index
    %c0_6 = arith.constant 0 : index
    %7 = vector.load %arg5[%c0_5, %c0_6] : memref<32x32xbf16, #tpu.memory_space<vmem>>, vector<32x32xbf16>
    %cst_7 = arith.constant dense<0.000000e+00> : vector<32x32xf32>
    %8 = tpu.matmul %6, %7, %cst_7 {dimension_numbers = #tpu.dot_dimension_numbers<[1], [0], [0], [1], [0, 0, 1, 1], [], []>} : vector<32x32xbf16>, vector<32x32xbf16>, vector<32x32xf32> -> vector<32x32xf32>
    %c0_8 = arith.constant 0 : index
    %c0_9 = arith.constant 0 : index
    %9 = vector.load %arg6[%c0_8, %c0_9] : memref<1x32xf32, #tpu.memory_space<vmem>>, vector<1x32xf32>
    %10 = vector.broadcast %9 : vector<1x32xf32> to vector<32x32xf32>
    %11 = arith.addf %8, %10 : vector<32x32xf32>
    %12 = vector.shape_cast %11 : vector<32x32xf32> to vector<2x16x32xf32>
    %c0_10 = arith.constant 0 : index
    %c0_11 = arith.constant 0 : index
    %c0_12 = arith.constant 0 : index
    %13 = vector.load %arg7[%c0_10, %c0_11, %c0_12] : memref<2x16x32xf32, #tpu.memory_space<vmem>>, vector<2x16x32xf32>
    tpu.vector_store %arg7[%c0_10, %c0_11, %c0_12], %12 {strides = array<i32>} : memref<2x16x32xf32, #tpu.memory_space<vmem>>, vector<2x16x32xf32>,
    return
  }
  func.func @transform_0(%arg0: i32, %arg1: i32, %arg2: i32) -> (i32, i32, i32) {
    %c0_i32 = arith.constant 0 : i32
    return %arg0, %arg1, %arg2 : i32, i32, i32
  }
  func.func @transform_1(%arg0: i32, %arg1: i32, %arg2: i32) -> (i32, i32, i32) {
    %c0_i32 = arith.constant 0 : i32
    %c0_i32_0 = arith.constant 0 : i32
    return %arg0, %arg2, %c0_i32 : i32, i32, i32
  }
  func.func @transform_2(%arg0: i32, %arg1: i32, %arg2: i32) -> (i32, i32) {
    %c0_i32 = arith.constant 0 : i32
    %c0_i32_0 = arith.constant 0 : i32
    %c0_i32_1 = arith.constant 0 : i32
    return %c0_i32, %c0_i32_0 : i32, i32
  }
  func.func @transform_3(%arg0: i32, %arg1: i32, %arg2: i32) -> (i32, i32) {
    %c0_i32 = arith.constant 0 : i32
    %c0_i32_0 = arith.constant 0 : i32
    %c0_i32_1 = arith.constant 0 : i32
    return %c0_i32, %c0_i32_0 : i32, i32
  }
  func.func @transform_4(%arg0: i32, %arg1: i32, %arg2: i32) -> (i32, i32, i32) {
    %c0_i32 = arith.constant 0 : i32
    %c0_i32_0 = arith.constant 0 : i32
    return %arg0, %arg1, %c0_i32 : i32, i32, i32
  }
}

</mosaic_0001>

<bundles_post_ra>
// kernel: gcn_block.1
= control target key start
LH: loop header
LB: loop body
LE: loop exit
PB: predicated region body
PF: predicated region fallthrough
CT: control target
= control target key end

     0   :  { %9 = vsyncpa [#allocation3], 0  ;;  %s393_s0 = inlined_call_operand.vmem [shape: f32[2,16,16], index: 0, kind: input, shape index: {}]   ;;  %s394_s1 = inlined_call_operand.hbm [shape: f32[2,16,32], index: 1, kind: input, shape index: {}]   ;;  %s395_s2 = inlined_call_operand.vmem [shape: bf16[32,32], index: 2, kind: input, shape index: {}]   ;;  %s396_s3 = inlined_call_operand.vmem [shape: f32[1,32], index: 3, kind: input, shape index: {}]   ;;  %s397_s4 = inlined_call_operand.hbm [shape: f32[2,16,32], index: 4, kind: output, shape index: {}]  }
   0x1   :  { %10 = vsyncpa [#allocation4], 0  ;;  %s323_s15 = smov [#allocation2]  }
   0x2   :  { %s18_s16 = sshll.u32 %s323_s15, 4  ;;  %s19_s16 = int_to_ptr.vmem [resolvable:$true] %s18_s16 }
   0x3   :  { %s287_s17 = scalar_lea.vmem %s19_s16, 512  ;;  %p292_p1 = scmp.lt.s32.totalorder %s19_s16, %s19_s16 }
   0x4   :  { %p288_p0 = scmp.ne.s32.totalorder %s19_s16, %s287_s17  ;;  %p293_p2 = scmp.lt.s32.totalorder %s287_s17, %s287_s17 }
   0x6   :  { %p294_p3 = por %p293_p2, %p292_p1 }
   0x8   :  { %p295_p4 = pnand %p294_p3, %p288_p0 }
   0xa   :  { %298 = shalt.err (!%p295_p4)
}
   0xb   :  { %s324_s18 = smov 128   ;;  %s325_s19 = smov 8  }
   0xc   :  { %24 = dma.hbm_to_vmem [thread:$0]  %s394_s1, 512, %s19_s16, [#allocation3], %s324_s18, %s324_s18, %s325_s19  }
   0xd   :  { %319 = dma.done.wait [#allocation3], 512  }
   0xe   :  { %320 = vsyncadd [#allocation3], 4294966784  ;;  %v326_v0 = vmov 0.0   ;;  %vm327_vm0 = vmmov 0   ;;  %v39_v1 = vld [vmem:[#allocation2] sm:$0xff]  ;;  %v40_v2 = vld [vmem:[#allocation2 + $0x8] sm:$0xff] }
   0xf   :  { %251 = vmatprep.subr.bf16.mxu0 %v326_v0  ;;  %257 = vmatprep.subr.bf16.mxu1 %v326_v0  ;;  %v41_v3 = vld [vmem:[#allocation2 + $0x10] sm:$0xff]  ;;  %v43_v4 = vpack.c.bf16 %v40_v2, %v39_v1  ;;  %v42_v5 = vld [vmem:[#allocation2 + $0x18] sm:$0xff]  ;;  %v33_v6 = vld [vmem:[%s393_s0] sm:$0xff]  ;;  %vm45_vm1 = vcmask 130048   ;;  %vm159_vm2 = vcmask 261120  }
  0x10   :  { %253 = vmatprep.mubr.msk.bf16.mxu0 %vm327_vm0, %v326_v0  ;;  %259 = vmatprep.mubr.msk.bf16.mxu1 %vm327_vm0, %v326_v0  ;;  %v34_v7 = vld [vmem:[%s393_s0 + $0x8] sm:$0xff]  ;;  %v44_v8 = vpack.c.bf16 %v42_v5, %v41_v3  ;;  %v35_v10 = vld [vmem:[%s393_s0 + $0x10] sm:$0xff]  ;;  %v36_v11 = vld [vmem:[%s393_s0 + $0x18] sm:$0xff] }
  0x11   :  { %v37_v9 = vpack.c.bf16 %v34_v7, %v33_v6  ;;  %252 = vmatpush3.bf16.msra.mxu0 %v43_v4  ;;  %v38_v12 = vpack.c.bf16 %v36_v11, %v35_v10  ;;  %v277_v13 = vld [vmem:[%s395_s2 + $0x8] sm:$0xff]   ;;  %v278_v14 = vld [vmem:[%s395_s2] sm:$0xff]   ;;  %s328_s2 = smov [#allocation5]  }
  0x12   :  { %258 = vmatpush3.bf16.msra.mxu1 %v44_v8  ;;  %263 = vmatprep.subr.bf16.mxu0 %v277_v13  ;;  %v238_v25 = vld [vmem:[%s396_s3] ss:$0 sm:$0xff]  ;;  %s224_s8 = sshll.u32 %s328_s2, 4  ;;  %s225_s8 = int_to_ptr.vmem [resolvable:$true] %s224_s8 }
  0x13   :  { %s299_s3 = scalar_lea.vmem %s225_s8, 512  ;;  %p304_p6 = scmp.lt.s32.totalorder %s225_s8, %s225_s8 }
  0x14   :  { %254 = vmatmul.mubr.msk.bf16.vlgmr.msra.gmra.mxu0 %vm45_vm1, %v37_v9  ;;  %p300_p5 = scmp.ne.s32.totalorder %s225_s8, %s299_s3  ;;  %p305_p7 = scmp.lt.s32.totalorder %s299_s3, %s299_s3 }
  0x15   :  { %260 = vmatmul.mubr.msk.bf16.vlgmr.msra.gmra.mxu1 %vm45_vm1, %v38_v12  ;;  %264 = vmatpush3.bf16.msra.mxu0 %v277_v13 }
  0x16   :  { %265 = vmatprep.subr.bf16.mxu0 %v278_v14  ;;  %p306_p8 = por %p305_p7, %p304_p6 }
  0x18   :  { %p307_p9 = pnand %p306_p8, %p300_p5 }
  0x19   :  { %266 = vmatpush3.bf16.msra.mxu0 %v278_v14 }
  0xd4   :  { %v83_v15 = vpop.f32.mrf.mxu0 }
  0xd5   :  { %v127_v16 = vpop.f32.mrf.mxu1 }
  0xd6   :  { %v255_v17 = vpop.f32.mrf.mxu0 }
  0xd7   :  { %v261_v18 = vpop.f32.mrf.mxu1 }
  0xd8   :  { %v86_v19 = vpop.f32.mrf.mxu0 }
  0xd9   :  { %v134_v20 = vpack.c.bf16 %v86_v19, %v83_v15  ;;  %v130_v21 = vpop.f32.mrf.mxu1 }
  0xda   :  { %v135_v22 = vpack.c.bf16 %v130_v21, %v127_v16  ;;  %v256_v23 = vpop.f32.mrf.mxu0 }
  0xdb   :  { %v262_v24 = vpop.f32.mrf.mxu1  ;;  %267 = vmatprep.mubr.msk.bf16.mxu0 %vm159_vm2, %v134_v20 }
  0xdc   :  { %268 = vmatmul.mubr.msk.bf16.vlgmr.msra.gmra.mxu0 %vm159_vm2, %v135_v22 }
 0x19c   :  { %v269_v26 = vpop.f32.mrf.mxu0 }
 0x19d   :  { %v209_v27 = vadd.f32 %v269_v26, %v238_v25 }
 0x19e   :  { %v200_v28 = vpop.f32.mrf.mxu0 }
 0x19f   :  { %217 = vst.msk [vmem:[#allocation5 + $0x10] sm:$0xff] %vm159_vm2, %v209_v27  ;;  %v201_v29 = vadd.f32 %v238_v25, %v200_v28 }
 0x1a0   :  { %v270_v30 = vpop.f32.mrf.mxu0 }
 0x1a1   :  { %215 = vst.msk [vmem:[#allocation5] sm:$0xff] %vm159_vm2, %v201_v29  ;;  %v212_v31 = vadd.f32 %v270_v30, %v238_v25 }
 0x1a2   :  { %v203_v32 = vpop.f32.mrf.mxu0 }
 0x1a3   :  { %218 = vst.msk [vmem:[#allocation5 + $0x18] sm:$0xff] %vm159_vm2, %v212_v31  ;;  %v204_v33 = vadd.f32 %v238_v25, %v203_v32 }
 0x1a5   :  { %216 = vst.msk [vmem:[#allocation5 + $0x8] sm:$0xff] %vm159_vm2, %v204_v33 }
 0x1a6   :  { %310 = shalt.err (!%p307_p9)
}
 0x1a7   :  { %230 = dma.vmem_to_hbm [thread:$0]  %s225_s8, 512, %s397_s4, [#allocation4], %s324_s18, %s324_s18, %s325_s19  }
 0x1a8   :  { %321 = dma.done.wait [#allocation4], 512  }
 0x1a9   :  { %322 = vsyncadd [#allocation4], 4294966784 }
 0x1aa   :  { %234 = vsyncpa [#allocation3], 1 }
 0x1ab   :  { %235 = vsyncpa [#allocation4], 1 }

</bundles_post_ra>
